<compile_context>
chip_gen: v5e
topology: v5e:2x2
jax: 0.10.0
libtpu: 0.0.40
codegen_flags: <defaults>
</compile_context>

<pallas_src>
import jax
import jax.numpy as jnp
from jax import lax
from jax.experimental import pallas as pl
from jax.experimental.pallas import tpu as pltpu


def _hybrid_parallel_kernel(x_ref, w_ref, o_ref):
    # x_ref : (B, K)   full activations, resident in VMEM
    # w_ref : (O, K)   full weight in torch Linear layout (out, in)
    # o_ref : (B, O)   full gathered output (single lane-dense store)
    o_ref[...] = lax.dot_general(
        x_ref[...],
        w_ref[...],
        dimension_numbers=(((1,), (1,)), ((), ())),  # contract K of x with K of W  -> x @ W.T
        preferred_element_type=jnp.float32,
    ).astype(o_ref.dtype)


def hybrid_parallel_layer(x, weight, world_size):
    """x: (B, input_size) f32; weight: (output_size, input_size) f32 (torch layout).

    world_size only defines how the weight would be sharded across ranks; since the
    per-rank slices are contiguous column blocks of x @ W.T, the all-gather + concat
    is realized by computing the full matmul and writing the full output slab.
    """
    B, K = x.shape
    O, K2 = weight.shape
    assert K == K2
    assert O % world_size == 0  # shardability invariant of the original module

    return pl.pallas_call(
        _hybrid_parallel_kernel,
        out_shape=jax.ShapeDtypeStruct((B, O), x.dtype),
        in_specs=[
            pl.BlockSpec(memory_space=pltpu.MemorySpace.VMEM),  # x, whole array
            pl.BlockSpec(memory_space=pltpu.MemorySpace.VMEM),  # weight, whole array
        ],
        out_specs=pl.BlockSpec(memory_space=pltpu.MemorySpace.VMEM),
    )(x, weight)


if __name__ == "__main__":
    input_size = 128
    output_size = 512
    world_size = 4
    batch = 8

    key = jax.random.PRNGKey(0)
    kx, kw = jax.random.split(key)

    # Deterministic synthetic parameters (torch Linear weight layout: (out, in)).
    bound = 1.0 / jnp.sqrt(input_size)
    full_weight = jax.random.uniform(
        kw, (output_size, input_size), dtype=jnp.float32, minval=-bound, maxval=bound
    )
    x = jax.random.normal(kx, (batch, input_size), dtype=jnp.float32)

    out = hybrid_parallel_layer(x, full_weight, world_size)
    out = jax.block_until_ready(out)

    # Reference 1: full matmul x @ W.T
    ref = x @ full_weight.T
    # Reference 2: explicit per-rank local matmuls + concat (the module's semantics)
    o_per_rank = output_size // world_size
    shards = [
        x @ full_weight[r * o_per_rank:(r + 1) * o_per_rank, :].T
        for r in range(world_size)
    ]
    ref_gathered = jnp.concatenate(shards, axis=-1)

    assert out.shape == (batch, output_size)
    assert jnp.allclose(out, ref, atol=1e-4, rtol=1e-4), "mismatch vs x @ W.T"
    assert jnp.allclose(out, ref_gathered, atol=1e-4, rtol=1e-4), "mismatch vs gathered shards"

    print("KERNEL_OK")
</pallas_src>

<mosaic_0001>
module attributes {stable_mosaic.version = 11 : i64} {
  func.func @_hybrid_parallel_kernel(%arg0: memref<8x128xf32, #tpu.memory_space<vmem>>, %arg1: memref<512x128xf32, #tpu.memory_space<vmem>>, %arg2: memref<8x512xf32, #tpu.memory_space<vmem>>) attributes {dimension_semantics = [], scalar_prefetch = 0 : i64, scratch_operands = 0 : i64, tpu.core_type = #tpu.core_type<tc>} {
    %c0 = arith.constant 0 : index
    %c0_0 = arith.constant 0 : index
    %0 = vector.load %arg0[%c0, %c0_0] : memref<8x128xf32, #tpu.memory_space<vmem>>, vector<8x128xf32>
    %c0_1 = arith.constant 0 : index
    %c0_2 = arith.constant 0 : index
    %1 = vector.load %arg1[%c0_1, %c0_2] : memref<512x128xf32, #tpu.memory_space<vmem>>, vector<512x128xf32>
    %cst = arith.constant dense<0.000000e+00> : vector<8x512xf32>
    %2 = tpu.matmul %0, %1, %cst {dimension_numbers = #tpu.dot_dimension_numbers<[1], [1], [0], [0], [0, 0, 1, 0], [], []>} : vector<8x128xf32>, vector<512x128xf32>, vector<8x512xf32> -> vector<8x512xf32>
    %c0_3 = arith.constant 0 : index
    %c0_4 = arith.constant 0 : index
    %3 = vector.load %arg2[%c0_3, %c0_4] : memref<8x512xf32, #tpu.memory_space<vmem>>, vector<8x512xf32>
    tpu.vector_store %arg2[%c0_3, %c0_4], %2 {strides = array<i32>} : memref<8x512xf32, #tpu.memory_space<vmem>>, vector<8x512xf32>,
    return
  }
}

</mosaic_0001>

<bundles_post_ra>
// kernel: tpu_custom_call.1
= control target key start
LH: loop header
LB: loop body
LE: loop exit
PB: predicated region body
PF: predicated region fallthrough
CT: control target
= control target key end

     0   :  { %7 = vsyncpa [#allocation3], 0  ;;  %s321_s0 = inlined_call_operand.hbm [shape: f32[8,128], index: 0, kind: input, shape index: {}]   ;;  %s322_s1 = inlined_call_operand.hbm [shape: f32[512,128], index: 1, kind: input, shape index: {}]   ;;  %s323_s2 = inlined_call_operand.hbm [shape: f32[8,512], index: 2, kind: output, shape index: {}]  }
   0x1   :  { %8 = vsyncpa [#allocation6], 0 }
   0x2   :  { %9 = vsyncpa [#allocation4], 0  ;;  %s15_s11 = sshll.u32 %s321_s0, 4  ;;  %s292_s12 = smov [#allocation2]   ;;  %s16_s11 = int_to_ptr.hbm [resolvable:$true] %s15_s11 }
   0x3   :  { %s17_s13 = sshll.u32 %s292_s12, 4  ;;  %s25_s16 = sshll.u32 %s322_s1, 4  ;;  %s18_s13 = int_to_ptr.vmem [resolvable:$true] %s17_s13  ;;  %s26_s16 = int_to_ptr.hbm [resolvable:$true] %s25_s16 }
   0x4   :  { %20 = dma.hbm_to_vmem [thread:$0]  %s16_s11, 128, %s18_s13, [#allocation3]  }
   0x5   :  { %s293_s17 = smov [#allocation5]   ;;  %s294_s19 = smov 128  }
   0x6   :  { %s27_s18 = sshll.u32 %s293_s17, 4  ;;  %s295_s20 = smov 8   ;;  %s28_s18 = int_to_ptr.vmem [resolvable:$true] %s27_s18 }
   0x7   :  { %33 = dma.hbm_to_vmem [thread:$0]  %s26_s16, 8192, %s28_s18, [#allocation6], %s294_s19, %s294_s19, %s295_s20  }
   0x8   :  { %286 = dma.done.wait [#allocation3], 128  }
   0x9   :  { %287 = vsyncadd [#allocation3], 4294967168 }
   0xa   :  { %288 = dma.done.wait [#allocation6], 8192  }
   0xb   :  { %289 = vsyncadd [#allocation6], 4294959104  ;;  %v90_v0 = vld [vmem:[#allocation5 + $0x178] sm:$0xff]  ;;  %v89_v4 = vld [vmem:[#allocation5 + $0x170] sm:$0xff]  ;;  %s296_s0 = smov [#allocation7]   ;;  %s198_s23 = sshll.u32 %s323_s2, 4  ;;  %s199_s23 = int_to_ptr.hbm [resolvable:$true] %s198_s23 }
   0xc   :  { %v106_v1 = vld [vmem:[#allocation5 + $0x1f8] sm:$0xff]  ;;  %147 = vmatpush.xpose.msra.mxu2 %v90_v0  ;;  %v105_v5 = vld [vmem:[#allocation5 + $0x1f0] sm:$0xff]  ;;  %v88_v8 = vld [vmem:[#allocation5 + $0x168] sm:$0xff]  ;;  %s196_s1 = sshll.u32 %s296_s0, 4  ;;  %s197_s1 = int_to_ptr.vmem [resolvable:$true] %s196_s1 }
   0xd   :  { %167 = vmatpush.xpose.msra.mxu3 %v106_v1  ;;  %v58_v2 = vld [vmem:[#allocation5 + $0x78] sm:$0xff]  ;;  %v57_v6 = vld [vmem:[#allocation5 + $0x70] sm:$0xff]  ;;  %v104_v9 = vld [vmem:[#allocation5 + $0x1e8] sm:$0xff] }
   0xe   :  { %v74_v3 = vld [vmem:[#allocation5 + $0xf8] sm:$0xff]  ;;  %107 = vmatpush.xpose.msra.mxu0 %v58_v2  ;;  %v73_v7 = vld [vmem:[#allocation5 + $0xf0] sm:$0xff]  ;;  %v56_v10 = vld [vmem:[#allocation5 + $0x68] sm:$0xff] }
   0xf   :  { %127 = vmatpush.xpose.msra.mxu1 %v74_v3  ;;  %v72_v11 = vld [vmem:[#allocation5 + $0xe8] sm:$0xff]  ;;  %v87_v12 = vld [vmem:[#allocation5 + $0x160] sm:$0xff]  ;;  %v86_v16 = vld [vmem:[#allocation5 + $0x158] sm:$0xff] }
  0x10   :  { %148 = vmatpush.xpose.msra.mxu2 %v89_v4  ;;  %v103_v13 = vld [vmem:[#allocation5 + $0x1e0] sm:$0xff]  ;;  %v102_v17 = vld [vmem:[#allocation5 + $0x1d8] sm:$0xff]  ;;  %v85_v20 = vld [vmem:[#allocation5 + $0x150] sm:$0xff] }
  0x11   :  { %168 = vmatpush.xpose.msra.mxu3 %v105_v5  ;;  %v55_v14 = vld [vmem:[#allocation5 + $0x60] sm:$0xff]  ;;  %v54_v18 = vld [vmem:[#allocation5 + $0x58] sm:$0xff]  ;;  %v101_v21 = vld [vmem:[#allocation5 + $0x1d0] sm:$0xff] }
  0x12   :  { %108 = vmatpush.xpose.msra.mxu0 %v57_v6  ;;  %v71_v15 = vld [vmem:[#allocation5 + $0xe0] sm:$0xff]  ;;  %v70_v19 = vld [vmem:[#allocation5 + $0xd8] sm:$0xff]  ;;  %v53_v22 = vld [vmem:[#allocation5 + $0x50] sm:$0xff] }
  0x13   :  { %128 = vmatpush.xpose.msra.mxu1 %v73_v7  ;;  %v69_v23 = vld [vmem:[#allocation5 + $0xd0] sm:$0xff]  ;;  %v84_v24 = vld [vmem:[#allocation5 + $0x148] sm:$0xff]  ;;  %v83_v28 = vld [vmem:[#allocation5 + $0x140] sm:$0xff] }
  0x14   :  { %149 = vmatpush.xpose.msra.mxu2 %v88_v8  ;;  %v100_v25 = vld [vmem:[#allocation5 + $0x1c8] sm:$0xff]  ;;  %v99_v29 = vld [vmem:[#allocation5 + $0x1c0] sm:$0xff]  ;;  %v82_v32 = vld [vmem:[#allocation5 + $0x138] sm:$0xff] }
  0x15   :  { %169 = vmatpush.xpose.msra.mxu3 %v104_v9  ;;  %v52_v26 = vld [vmem:[#allocation5 + $0x48] sm:$0xff]  ;;  %v51_v30 = vld [vmem:[#allocation5 + $0x40] sm:$0xff]  ;;  %v98_v33 = vld [vmem:[#allocation5 + $0x1b8] sm:$0xff] }
  0x16   :  { %109 = vmatpush.xpose.msra.mxu0 %v56_v10  ;;  %v68_v27 = vld [vmem:[#allocation5 + $0xc8] sm:$0xff]  ;;  %v67_v31 = vld [vmem:[#allocation5 + $0xc0] sm:$0xff]  ;;  %v50_v34 = vld [vmem:[#allocation5 + $0x38] sm:$0xff] }
  0x17   :  { %129 = vmatpush.xpose.msra.mxu1 %v72_v11  ;;  %v66_v35 = vld [vmem:[#allocation5 + $0xb8] sm:$0xff]  ;;  %v81_v36 = vld [vmem:[#allocation5 + $0x130] sm:$0xff]  ;;  %v80_v40 = vld [vmem:[#allocation5 + $0x128] sm:$0xff] }
  0x18   :  { %150 = vmatpush.xpose.msra.mxu2 %v87_v12  ;;  %v97_v37 = vld [vmem:[#allocation5 + $0x1b0] sm:$0xff]  ;;  %v96_v41 = vld [vmem:[#allocation5 + $0x1a8] sm:$0xff]  ;;  %v79_v44 = vld [vmem:[#allocation5 + $0x120] sm:$0xff] }
  0x19   :  { %170 = vmatpush.xpose.msra.mxu3 %v103_v13  ;;  %v49_v38 = vld [vmem:[#allocation5 + $0x30] sm:$0xff]  ;;  %v48_v42 = vld [vmem:[#allocation5 + $0x28] sm:$0xff]  ;;  %v95_v45 = vld [vmem:[#allocation5 + $0x1a0] sm:$0xff] }
  0x1a   :  { %110 = vmatpush.xpose.msra.mxu0 %v55_v14  ;;  %v65_v39 = vld [vmem:[#allocation5 + $0xb0] sm:$0xff]  ;;  %v64_v43 = vld [vmem:[#allocation5 + $0xa8] sm:$0xff]  ;;  %v47_v46 = vld [vmem:[#allocation5 + $0x20] sm:$0xff] }
  0x1b   :  { %130 = vmatpush.xpose.msra.mxu1 %v71_v15  ;;  %v63_v47 = vld [vmem:[#allocation5 + $0xa0] sm:$0xff]  ;;  %v78_v48 = vld [vmem:[#allocation5 + $0x118] sm:$0xff]  ;;  %v77_v52 = vld [vmem:[#allocation5 + $0x110] sm:$0xff] }
  0x1c   :  { %151 = vmatpush.xpose.msra.mxu2 %v86_v16  ;;  %v94_v49 = vld [vmem:[#allocation5 + $0x198] sm:$0xff]  ;;  %v93_v53 = vld [vmem:[#allocation5 + $0x190] sm:$0xff]  ;;  %v76_v56 = vld [vmem:[#allocation5 + $0x108] sm:$0xff] }
  0x1d   :  { %171 = vmatpush.xpose.msra.mxu3 %v102_v17  ;;  %v46_v50 = vld [vmem:[#allocation5 + $0x18] sm:$0xff]  ;;  %v45_v54 = vld [vmem:[#allocation5 + $0x10] sm:$0xff]  ;;  %v92_v57 = vld [vmem:[#allocation5 + $0x188] sm:$0xff] }
  0x1e   :  { %111 = vmatpush.xpose.msra.mxu0 %v54_v18  ;;  %v62_v51 = vld [vmem:[#allocation5 + $0x98] sm:$0xff]  ;;  %v61_v55 = vld [vmem:[#allocation5 + $0x90] sm:$0xff]  ;;  %v44_v58 = vld [vmem:[#allocation5 + $0x8] sm:$0xff] }
  0x1f   :  { %131 = vmatpush.xpose.msra.mxu1 %v70_v19  ;;  %v60_v59 = vld [vmem:[#allocation5 + $0x88] sm:$0xff]  ;;  %v75_v60 = vld [vmem:[#allocation5 + $0x100] sm:$0xff]  ;;  %v42_v0 = vld [vmem:[#allocation2] sm:$0xff] }
  0x20   :  { %152 = vmatpush.xpose.msra.mxu2 %v85_v20  ;;  %v91_v61 = vld [vmem:[#allocation5 + $0x180] sm:$0xff] }
  0x21   :  { %172 = vmatpush.xpose.msra.mxu3 %v101_v21  ;;  %v43_v62 = vld [vmem:[#allocation5] sm:$0xff] }
  0x22   :  { %112 = vmatpush.xpose.msra.mxu0 %v53_v22  ;;  %v59_v63 = vld [vmem:[#allocation5 + $0x80] sm:$0xff] }
  0x23   :  { %132 = vmatpush.xpose.msra.mxu1 %v69_v23 }
  0x24   :  { %153 = vmatpush.xpose.msra.mxu2 %v84_v24 }
  0x25   :  { %173 = vmatpush.xpose.msra.mxu3 %v100_v25 }
  0x26   :  { %113 = vmatpush.xpose.msra.mxu0 %v52_v26 }
  0x27   :  { %133 = vmatpush.xpose.msra.mxu1 %v68_v27 }
  0x28   :  { %154 = vmatpush.xpose.msra.mxu2 %v83_v28 }
  0x29   :  { %174 = vmatpush.xpose.msra.mxu3 %v99_v29 }
  0x2a   :  { %114 = vmatpush.xpose.msra.mxu0 %v51_v30 }
  0x2b   :  { %134 = vmatpush.xpose.msra.mxu1 %v67_v31 }
  0x2c   :  { %155 = vmatpush.xpose.msra.mxu2 %v82_v32 }
  0x2d   :  { %175 = vmatpush.xpose.msra.mxu3 %v98_v33 }
  0x2e   :  { %115 = vmatpush.xpose.msra.mxu0 %v50_v34 }
  0x2f   :  { %135 = vmatpush.xpose.msra.mxu1 %v66_v35 }
  0x30   :  { %156 = vmatpush.xpose.msra.mxu2 %v81_v36 }
  0x31   :  { %176 = vmatpush.xpose.msra.mxu3 %v97_v37 }
  0x32   :  { %116 = vmatpush.xpose.msra.mxu0 %v49_v38 }
  0x33   :  { %136 = vmatpush.xpose.msra.mxu1 %v65_v39 }
  0x34   :  { %157 = vmatpush.xpose.msra.mxu2 %v80_v40 }
  0x35   :  { %177 = vmatpush.xpose.msra.mxu3 %v96_v41 }
  0x36   :  { %117 = vmatpush.xpose.msra.mxu0 %v48_v42 }
  0x37   :  { %137 = vmatpush.xpose.msra.mxu1 %v64_v43 }
  0x38   :  { %158 = vmatpush.xpose.msra.mxu2 %v79_v44 }
  0x39   :  { %178 = vmatpush.xpose.msra.mxu3 %v95_v45 }
  0x3a   :  { %118 = vmatpush.xpose.msra.mxu0 %v47_v46 }
  0x3b   :  { %138 = vmatpush.xpose.msra.mxu1 %v63_v47 }
  0x3c   :  { %159 = vmatpush.xpose.msra.mxu2 %v78_v48 }
  0x3d   :  { %179 = vmatpush.xpose.msra.mxu3 %v94_v49 }
  0x3e   :  { %119 = vmatpush.xpose.msra.mxu0 %v46_v50 }
  0x3f   :  { %139 = vmatpush.xpose.msra.mxu1 %v62_v51 }
  0x40   :  { %160 = vmatpush.xpose.msra.mxu2 %v77_v52 }
  0x41   :  { %180 = vmatpush.xpose.msra.mxu3 %v93_v53 }
  0x42   :  { %120 = vmatpush.xpose.msra.mxu0 %v45_v54 }
  0x43   :  { %140 = vmatpush.xpose.msra.mxu1 %v61_v55 }
  0x44   :  { %161 = vmatpush.xpose.msra.mxu2 %v76_v56 }
  0x45   :  { %181 = vmatpush.xpose.msra.mxu3 %v92_v57 }
  0x46   :  { %121 = vmatpush.xpose.msra.mxu0 %v44_v58 }
  0x47   :  { %141 = vmatpush.xpose.msra.mxu1 %v60_v59 }
  0x48   :  { %162 = vmatpush.xpose.msra.mxu2 %v75_v60 }
  0x49   :  { %182 = vmatpush.xpose.msra.mxu3 %v91_v61 }
  0x4a   :  { %122 = vmatpush.xpose.msra.mxu0 %v43_v62 }
  0x4b   :  { %142 = vmatpush.xpose.msra.mxu1 %v59_v63  ;;  %163 = vmatmul.f32.vlgmr.msra.gmra.mxu2 %v42_v0 }
  0x4c   :  { %183 = vmatmul.f32.vlgmr.msra.gmra.mxu3 %v42_v0 }
  0x4d   :  { %123 = vmatmul.f32.vlgmr.msra.gmra.mxu0 %v42_v0 }
  0x4e   :  { %143 = vmatmul.f32.vlgmr.msra.gmra.mxu1 %v42_v0 }
  0xca   :  { %v124_v1 = vpop.f32.mrf.mxu0 }
  0xcb   :  { %v144_v2 = vpop.f32.mrf.mxu1  ;;  %187 = vst [vmem:[#allocation7] sm:$0xff] %v124_v1 }
  0xcc   :  { %188 = vst [vmem:[#allocation7 + $0x8] sm:$0xff] %v144_v2 }
  0xce   :  { %v164_v3 = vpop.f32.mrf.mxu2 }
  0xcf   :  { %v184_v4 = vpop.f32.mrf.mxu3  ;;  %189 = vst [vmem:[#allocation7 + $0x10] sm:$0xff] %v164_v3 }
  0xd0   :  { %190 = vst [vmem:[#allocation7 + $0x18] sm:$0xff] %v184_v4 }
  0xd1   :  { %201 = dma.vmem_to_hbm [thread:$0]  %s197_s1, 512, %s199_s23, [#allocation4]  }
  0xd2   :  { %290 = dma.done.wait [#allocation4], 512  }
  0xd3   :  { %291 = vsyncadd [#allocation4], 4294966784 }
  0xd4   :  { %206 = vsyncpa [#allocation3], 1 }
  0xd5   :  { %207 = vsyncpa [#allocation6], 1 }
  0xd6   :  { %208 = vsyncpa [#allocation4], 1 }

</bundles_post_ra>
